<compile_context>
chip_gen: v6e
topology: v6e:2x2x1
jax: 0.10.0
libtpu: 0.0.40
codegen_flags: <defaults>
</compile_context>

<pallas_src>
import functools
import math

import jax
import jax.numpy as jnp
from jax.experimental import pallas as pl
from jax.experimental.pallas import tpu as pltpu


def _pos_embed_kernel(pos_ref, freq_ref, phase_ref, out_ref, *, fold):
    """One row-tile of sinusoidal positional embeddings.

    pos_ref:   (tile, fold) f32 -- `fold` consecutive positions per output row
    freq_ref:  (1, d_out)   f32 -- [inv_freq | inv_freq]          (resident)
    phase_ref: (1, d_out)   f32 -- [0 ...    | pi/2 ...]          (resident)
    out_ref:   (tile, fold * d_out) out dtype
    """
    freq = freq_ref[...]
    phase = phase_ref[...]
    pos = pos_ref[...]
    if fold == 1:
        arg = pos * freq + phase                       # (tile, d_out), VPU
    else:
        # Narrow-feature path: lay `fold` consecutive rows side by side along
        # the lane axis so the single store is lane-dense.  The concat is XLU
        # work that overlaps with the VALU sin polynomial.
        arg = jnp.concatenate(
            [pos[:, j:j + 1] * freq + phase for j in range(fold)], axis=-1)
    # cos(x) == sin(x + pi/2): one uniform sin path, no second half / concat.
    # TODO(synk): a hand-rolled shared-range-reduction sincos could further cut
    # the VALU polynomial work if a bundle dump shows VALU-bound on v6e/v7x.
    out_ref[...] = jnp.sin(arg).astype(out_ref.dtype)


def _ceil_div(a, b):
    return -(-a // b)


def _round_up(a, b):
    return _ceil_div(a, b) * b


@functools.partial(jax.jit, static_argnames=("out_dtype",))
def position_embedding(pos_seqs, inv_freq, *, out_dtype=jnp.float32):
    """JAX/Pallas equivalent of PositionEmbedding.forward.

    pos_seqs: [S] or [B, S] (any numeric dtype; cast to float32 like torch .float())
    inv_freq: [d_model // 2] buffer (1 / 10000**(2*i/d_model))
    returns:  [S, 2*(d_model//2)] or [B, S, 2*(d_model//2)], out_dtype
    """
    squeeze_batch = pos_seqs.ndim == 1
    if squeeze_batch:
        pos_seqs = pos_seqs[None, :]

    B, S = pos_seqs.shape
    H = inv_freq.shape[0]
    d_out = 2 * H
    rows = B * S
    itemsize = jnp.dtype(out_dtype).itemsize

    # --- narrow-feature lane folding --------------------------------------
    fold = 1
    if d_out < 128:
        k = _ceil_div(128, d_out)
        if rows % k == 0:           # fall back to the plain path otherwise
            fold = k
    rows_eff = rows // fold
    width = fold * d_out

    # --- tile selection against an explicit VMEM budget --------------------
    OUT_BUF_BUDGET = 8 * 1024 * 1024          # double-buffered output block
    tile = OUT_BUF_BUDGET // (2 * width * itemsize)
    tile = max(8, min(1024, (tile // 8) * 8))
    if rows_eff >= 16:
        # >= 2 grid steps so ("parallel",) can shard across both v7x TCs.
        tile = min(tile, _round_up(_ceil_div(rows_eff, 2), 8))
    if rows_eff < 8:
        tile = rows_eff                        # full-dim block (tiny inputs)
    else:
        tile = min(tile, (rows_eff // 8) * 8)  # never exceed the array extent

    grid = (_ceil_div(rows_eff, tile),)

    # --- inputs ------------------------------------------------------------
    pos_f = pos_seqs.astype(jnp.float32).reshape(rows_eff, fold)
    inv_f = inv_freq.astype(jnp.float32)
    freq_row = jnp.concatenate([inv_f, inv_f]).reshape(1, d_out)
    phase_row = jnp.concatenate(
        [jnp.zeros((H,), jnp.float32),
         jnp.full((H,), math.pi / 2.0, dtype=jnp.float32)]).reshape(1, d_out)

    # --- VMEM budget / compiler params --------------------------------------
    width_pad = _round_up(width, 128)
    vmem_needed = 2 * tile * (width_pad * itemsize + 128 * 4) + 64 * 1024
    vmem_limit = int(min(32 << 20, max(2 * vmem_needed, 8 << 20)))

    out = pl.pallas_call(
        functools.partial(_pos_embed_kernel, fold=fold),
        out_shape=jax.ShapeDtypeStruct((rows_eff, width), out_dtype),
        grid=grid,
        in_specs=[
            pl.BlockSpec((tile, fold), lambda i: (i, 0)),
            pl.BlockSpec((1, d_out), lambda i: (0, 0)),    # resident tables
            pl.BlockSpec((1, d_out), lambda i: (0, 0)),
        ],
        out_specs=pl.BlockSpec((tile, width), lambda i: (i, 0)),
        compiler_params=pltpu.CompilerParams(
            dimension_semantics=("parallel",),
            vmem_limit_bytes=vmem_limit),
        cost_estimate=pl.CostEstimate(
            flops=2 * rows * d_out,
            transcendentals=rows * d_out,
            bytes_accessed=rows * d_out * itemsize + rows * 4 + 2 * d_out * 4),
    )(pos_f, freq_row, phase_row)

    # Contiguity-preserving reshape (no data movement).
    out = out.reshape(B, S, d_out)
    if squeeze_batch:
        out = out[0]
    return out


def make_inv_freq(d_model):
    """Deterministic buffer init, identical to the PyTorch register_buffer."""
    i = jnp.arange(0.0, d_model // 2, dtype=jnp.float32)
    return 1.0 / jnp.power(10000.0, 2.0 * i / d_model)


def _reference(pos_seqs, inv_freq):
    """Pure-JAX reference matching the PyTorch forward exactly."""
    pos = pos_seqs.astype(jnp.float32)
    outer = pos[..., :, None] * inv_freq[None, :]
    return jnp.concatenate([jnp.sin(outer), jnp.cos(outer)], axis=-1)


if __name__ == "__main__":
    d_model = 32
    batch, seq = 2, 8

    key = jax.random.PRNGKey(0)
    k1, k2 = jax.random.split(key)

    inv_freq = make_inv_freq(d_model)

    # Batched case: [batch, seq] positions (folded narrow-feature path).
    pos_2d = jax.random.randint(k1, (batch, seq), 0, 100).astype(jnp.float32)
    out_2d = position_embedding(pos_2d, inv_freq)
    jax.block_until_ready(out_2d)
    ref_2d = _reference(pos_2d, inv_freq)
    assert out_2d.shape == (batch, seq, d_model), out_2d.shape
    assert jnp.allclose(out_2d, ref_2d, atol=1e-4), "batched mismatch"

    # 1-D case: [seq] positions.
    pos_1d = jnp.arange(seq, dtype=jnp.float32)
    out_1d = position_embedding(pos_1d, inv_freq)
    jax.block_until_ready(out_1d)
    ref_1d = _reference(pos_1d, inv_freq)
    assert out_1d.shape == (seq, d_model), out_1d.shape
    assert jnp.allclose(out_1d, ref_1d, atol=1e-4), "1-D mismatch"

    # Larger case: exercises the row grid (>= 2 steps) + partial last block,
    # still on the folded path.  Phase trick vs exact cos differs by ~ULP of
    # the large argument, hence the slightly looser tolerance.
    pos_big = jax.random.randint(k2, (2, 300), 0, 1000).astype(jnp.float32)
    out_big = position_embedding(pos_big, inv_freq)
    jax.block_until_ready(out_big)
    ref_big = _reference(pos_big, inv_freq)
    assert out_big.shape == (2, 300, d_model), out_big.shape
    assert jnp.allclose(out_big, ref_big, atol=5e-4), "gridded mismatch"

    # Wide-feature case (d_out >= 128): unfolded path, 2 grid steps, partial
    # last block, no padding / slicing anywhere.
    d_model_w = 256
    inv_freq_w = make_inv_freq(d_model_w)
    out_wide = position_embedding(pos_big, inv_freq_w)
    jax.block_until_ready(out_wide)
    ref_wide = _reference(pos_big, inv_freq_w)
    assert out_wide.shape == (2, 300, d_model_w), out_wide.shape
    assert jnp.allclose(out_wide, ref_wide, atol=5e-4), "wide mismatch"

    # Optional bf16 output path (f32 math, bf16 store) for mem-bound consumers.
    out_bf16 = position_embedding(pos_2d, inv_freq, out_dtype=jnp.bfloat16)
    jax.block_until_ready(out_bf16)
    assert out_bf16.dtype == jnp.bfloat16
    assert jnp.allclose(out_bf16.astype(jnp.float32), ref_2d, atol=1e-2), "bf16 mismatch"

    print("KERNEL_OK")
</pallas_src>

<mosaic_0001>
module attributes {stable_mosaic.version = 11 : i64} {
  func.func @_pos_embed_kernel(%arg0: i32, %arg1: memref<4x4xf32, #tpu.memory_space<vmem>>, %arg2: memref<1x32xf32, #tpu.memory_space<vmem>>, %arg3: memref<1x32xf32, #tpu.memory_space<vmem>>, %arg4: memref<4x128xf32, #tpu.memory_space<vmem>>) attributes {dimension_semantics = [#tpu.dimension_semantics<parallel>], iteration_bounds = array<i64: 1>, scalar_prefetch = 0 : i64, scratch_operands = 0 : i64, tpu.core_type = #tpu.core_type<tc>, window_params = [{transform_indices = @transform_0, window_bounds = array<i64: 4, 4>}, {pipeline_mode = #tpu.pipeline_mode<synchronous>, transform_indices = @transform_1, window_bounds = array<i64: 1, 32>}, {pipeline_mode = #tpu.pipeline_mode<synchronous>, transform_indices = @transform_2, window_bounds = array<i64: 1, 32>}, {transform_indices = @transform_3, window_bounds = array<i64: 4, 128>}]} {
    %c0 = arith.constant 0 : index
    %c0_0 = arith.constant 0 : index
    %0 = vector.load %arg2[%c0, %c0_0] : memref<1x32xf32, #tpu.memory_space<vmem>>, vector<1x32xf32>
    %c0_1 = arith.constant 0 : index
    %c0_2 = arith.constant 0 : index
    %1 = vector.load %arg3[%c0_1, %c0_2] : memref<1x32xf32, #tpu.memory_space<vmem>>, vector<1x32xf32>
    %c0_3 = arith.constant 0 : index
    %c0_4 = arith.constant 0 : index
    %2 = vector.load %arg1[%c0_3, %c0_4] : memref<4x4xf32, #tpu.memory_space<vmem>>, vector<4x4xf32>
    %3 = vector.extract_strided_slice %2 {offsets = [0, 0], sizes = [4, 1], strides = [1, 1]} : vector<4x4xf32> to vector<4x1xf32>
    %4 = vector.broadcast %3 : vector<4x1xf32> to vector<4x32xf32>
    %5 = vector.broadcast %0 : vector<1x32xf32> to vector<4x32xf32>
    %6 = arith.mulf %4, %5 : vector<4x32xf32>
    %7 = vector.broadcast %1 : vector<1x32xf32> to vector<4x32xf32>
    %8 = arith.addf %6, %7 : vector<4x32xf32>
    %9 = vector.extract_strided_slice %2 {offsets = [0, 1], sizes = [4, 1], strides = [1, 1]} : vector<4x4xf32> to vector<4x1xf32>
    %10 = vector.broadcast %9 : vector<4x1xf32> to vector<4x32xf32>
    %11 = vector.broadcast %0 : vector<1x32xf32> to vector<4x32xf32>
    %12 = arith.mulf %10, %11 : vector<4x32xf32>
    %13 = vector.broadcast %1 : vector<1x32xf32> to vector<4x32xf32>
    %14 = arith.addf %12, %13 : vector<4x32xf32>
    %15 = vector.extract_strided_slice %2 {offsets = [0, 2], sizes = [4, 1], strides = [1, 1]} : vector<4x4xf32> to vector<4x1xf32>
    %16 = vector.broadcast %15 : vector<4x1xf32> to vector<4x32xf32>
    %17 = vector.broadcast %0 : vector<1x32xf32> to vector<4x32xf32>
    %18 = arith.mulf %16, %17 : vector<4x32xf32>
    %19 = vector.broadcast %1 : vector<1x32xf32> to vector<4x32xf32>
    %20 = arith.addf %18, %19 : vector<4x32xf32>
    %21 = vector.extract_strided_slice %2 {offsets = [0, 3], sizes = [4, 1], strides = [1, 1]} : vector<4x4xf32> to vector<4x1xf32>
    %22 = vector.broadcast %21 : vector<4x1xf32> to vector<4x32xf32>
    %23 = vector.broadcast %0 : vector<1x32xf32> to vector<4x32xf32>
    %24 = arith.mulf %22, %23 : vector<4x32xf32>
    %25 = vector.broadcast %1 : vector<1x32xf32> to vector<4x32xf32>
    %26 = arith.addf %24, %25 : vector<4x32xf32>
    %27 = tpu.concatenate %8, %14, %20, %26 in 1 : vector<4x32xf32>, vector<4x32xf32>, vector<4x32xf32>, vector<4x32xf32> -> vector<4x128xf32>
    %28 = math.sin %27 : vector<4x128xf32>
    %c0_5 = arith.constant 0 : index
    %c0_6 = arith.constant 0 : index
    %29 = vector.load %arg4[%c0_5, %c0_6] : memref<4x128xf32, #tpu.memory_space<vmem>>, vector<4x128xf32>
    tpu.vector_store %arg4[%c0_5, %c0_6], %28 {strides = array<i32>} : memref<4x128xf32, #tpu.memory_space<vmem>>, vector<4x128xf32>,
    return
  }
  func.func @transform_0(%arg0: i32) -> (i32, i32) {
    %c0_i32 = arith.constant 0 : i32
    %c0_i32_0 = arith.constant 0 : i32
    return %arg0, %c0_i32 : i32, i32
  }
  func.func @transform_1(%arg0: i32) -> (i32, i32) {
    %c0_i32 = arith.constant 0 : i32
    %c0_i32_0 = arith.constant 0 : i32
    %c0_i32_1 = arith.constant 0 : i32
    return %c0_i32, %c0_i32_0 : i32, i32
  }
  func.func @transform_2(%arg0: i32) -> (i32, i32) {
    %c0_i32 = arith.constant 0 : i32
    %c0_i32_0 = arith.constant 0 : i32
    %c0_i32_1 = arith.constant 0 : i32
    return %c0_i32, %c0_i32_0 : i32, i32
  }
  func.func @transform_3(%arg0: i32) -> (i32, i32) {
    %c0_i32 = arith.constant 0 : i32
    %c0_i32_0 = arith.constant 0 : i32
    return %arg0, %c0_i32 : i32, i32
  }
}

</mosaic_0001>

<bundles_post_ra>
// kernel: position_embedding.1
= control target key start
LH: loop header
LB: loop body
LE: loop exit
PB: predicated region body
PF: predicated region fallthrough
CT: control target
= control target key end

     0   :  { %v213_v0 = vmov 1   ;;  %v214_v2 = vmov 3   ;;  %v215_v3 = vmov 2   ;;  %v216_v4 = vmov 0   ;;  %s218_s18 = smov 96   ;;  %s279_s0 = inlined_call_operand.vmem [shape: f32[4,4], index: 0, kind: input, shape index: {}]   ;;  %s280_s1 = inlined_call_operand.vmem [shape: f32[1,32], index: 1, kind: input, shape index: {}]   ;;  %s281_s2 = inlined_call_operand.vmem [shape: f32[1,32], index: 2, kind: input, shape index: {}]   ;;  %s282_s3 = inlined_call_operand.vmem [shape: f32[4,128], index: 3, kind: output, shape index: {}]  }
   0x1   :  { %204 = vset.pattern.permute.xlu0 %v213_v0  ;;  %v16_v1 = vld [vmem:[%s279_s0] sm:$0xf]  ;;  %206 = vset.pattern.permute.xlu1 %v214_v2  ;;  %s217_s0 = smov 32   ;;  %vm66_vm0 = vcmask 261120   ;;  %vm68_vm1 = vcmask 523264   ;;  %vm70_vm2 = vcmask 785408  }
   0x2   :  { %37 = vperm.xlu0 %204, %v16_v1   ;;  %49 = vperm.xlu1 %206, %v16_v1   ;;  %v181_v5 = vld [vmem:[%s280_s1] ss:$0 sm:$0xff]  ;;  %s219_s1 = smov 64   ;;  %v220_v35 = vmov 683565275  }
   0x3   :  { %v182_v6 = vld [vmem:[%s281_s2] ss:$0 sm:$0xff]  ;;  %v221_v37 = vmov 2475754826   ;;  %v222_v40 = vmov 2131351028  }
   0x4   :  { %v223_v43 = vmov 2102212464   ;;  %v224_v46 = vmov 920167782   ;;  %v225_v49 = vmov 1326507024  }
   0x6   :  { %205 = vset.pattern.permute.xlu0 %v215_v3  ;;  %207 = vset.pattern.permute.xlu1 %v216_v4 }
   0x7   :  { %43 = vperm.xlu0 %205, %v16_v1   ;;  %19 = vperm.xlu1 %207, %v16_v1  }
   0xb   :  { %208 = vset.pattern.permute.xlu0 %v214_v2 }
  0x7d   :  { %v38_v7 = vpop.permute.xlu0 %37  ;;  %v50_v8 = vpop.permute.xlu1 %49 }
  0x7e   :  { %v40_v9 = vmul.f32 %v181_v5, %v38_v7  ;;  %v52_v10 = vmul.f32 %v181_v5, %v50_v8 }
  0x80   :  { %v41_v11 = vadd.f32 %v182_v6, %v40_v9  ;;  %v53_v13 = vadd.f32 %v182_v6, %v52_v10 }
  0x82   :  { %55 = vrot.lane.b32.xlu1 %v41_v11, %s217_s0  ;;  %v44_v12 = vpop.permute.xlu0 %43  ;;  %v20_v14 = vpop.permute.xlu1 %19 }
  0x83   :  { %v46_v15 = vmul.f32 %v181_v5, %v44_v12  ;;  %v28_v16 = vmul.f32 %v181_v5, %v20_v14 }
  0x85   :  { %v47_v17 = vadd.f32 %v182_v6, %v46_v15  ;;  %v35_v18 = vadd.f32 %v182_v6, %v28_v16 }
  0x86   :  { %63 = vrot.lane.b32.xlu1 %v53_v13, %s218_s18 }
  0x87   :  { %59 = vrot.lane.b32.xlu0 %v47_v17, %s219_s1 }
  0xf4   :  { %v56_v19 = vpop.permute.xlu1 %55 }
  0xf5   :  { %v67_v21 = vsel %vm66_vm0, %v35_v18, %v56_v19 }
  0xf8   :  { %v64_v20 = vpop.permute.xlu1 %63 }
  0xf9   :  { %v60_v22 = vpop.permute.xlu0 %59 }
  0xfa   :  { %v69_v23 = vsel %vm68_vm1, %v67_v21, %v60_v22 }
  0xfb   :  { %v255_v24 = vsel %vm70_vm2, %v69_v23, %v64_v20 }
  0xfc   :  { %v75_v25 = vand.u32 2139095040, %v255_v24  ;;  %v72_v29 = vand.u32 2147483647, %v255_v24  ;;  %vm74_vm10 = vcmp.lt.s32.totalorder %v255_v24, 0  ;;  %vm164_vm15 = vweird.f32 %v255_v24 }
  0xfe   :  { %v76_v26 = vshrl.u32 %v75_v25, 23  ;;  %v79_v32 = vand.u32 8388607, %v72_v29  ;;  %vm73_vm11 = vcmp.le.f32.partialorder %v72_v29, 0.7853982 }
 0x100   :  { %v183_v27 = vadd.s32 4294967169, %v76_v26  ;;  %v80_v51 = vor.u32 8388608, %v79_v32 }
 0x102   :  { %v82_v28 = vadd.s32 1, %v183_v27  ;;  %v120_v1 = vshll.u32 %v80_v51, 8 }
 0x104   :  { %vm83_vm3 = vcmp.gt.s32.totalorder %v82_v28, 0 }
 0x105   :  { %v84_v30 = vsel %vm83_vm3, %v82_v28, 0 }
 0x106   :  { %v86_v31 = vand.u32 31, %v84_v30  ;;  %v85_v34 = vshrl.u32 %v84_v30, 5 }
 0x108   :  { %v87_v33 = vsub.s32 32, %v86_v31  ;;  %v89_v36 = vshll.u32 %v220_v35, %v86_v31  ;;  %v92_v38 = vshll.u32 %v221_v37, %v86_v31  ;;  %v95_v42 = vshll.u32 %v222_v40, %v86_v31 }
 0x109   :  { %v98_v45 = vshll.u32 %v223_v43, %v86_v31  ;;  %v101_v48 = vshll.u32 %v224_v46, %v86_v31  ;;  %vm104_vm4 = vcmp.lt.s32.totalorder %v85_v34, 1  ;;  %vm107_vm5 = vcmp.lt.s32.totalorder %v85_v34, 4 }
 0x10a   :  { %v90_v39 = vshrl.u32 %v221_v37, %v87_v33  ;;  %v93_v41 = vshrl.u32 %v222_v40, %v87_v33  ;;  %v96_v44 = vshrl.u32 %v223_v43, %v87_v33  ;;  %v99_v47 = vshrl.u32 %v224_v46, %v87_v33 }
 0x10b   :  { %v102_v50 = vshrl.u32 %v225_v49, %v87_v33  ;;  %v88_v60 = vshrl.u32 %v220_v35, %v87_v33  ;;  %vm106_vm6 = vcmp.lt.s32.totalorder %v85_v34, 3  ;;  %vm105_vm7 = vcmp.lt.s32.totalorder %v85_v34, 2 }
 0x10c   :  { %v91_v52 = vor.u32 %v90_v39, %v89_v36  ;;  %v94_v53 = vor.u32 %v93_v41, %v92_v38  ;;  %v97_v54 = vor.u32 %v96_v44, %v95_v42  ;;  %v100_v55 = vor.u32 %v99_v47, %v98_v45 }
 0x10d   :  { %v103_v56 = vor.u32 %v102_v50, %v101_v48 }
 0x10e   :  { %v109_v57 = vsel %vm107_vm5, %v97_v54, 2102212464  ;;  %v112_v58 = vsel %vm104_vm4, %v91_v52, %v94_v53  ;;  %v116_v59 = vsel %vm104_vm4, %v94_v53, %v97_v54  ;;  %v113_v61 = vsel %vm107_vm5, %v100_v55, 920167782 }
 0x10f   :  { %v117_v62 = vsel %vm107_vm5, %v103_v56, 1326507024  ;;  %v114_v63 = vsel %vm106_vm6, %v97_v54, %v113_v61  ;;  %v108_v2 = vsel %vm104_vm4, %v88_v60, %v91_v52  ;;  %v110_v3 = vsel %vm106_vm6, %v94_v53, %v109_v57 }
 0x110   :  { %v118_v0 = vsel %vm106_vm6, %v100_v55, %v117_v62  ;;  %v115_v4 = vsel %vm105_vm7, %v112_v58, %v114_v63  ;;  %v111_v10 = vsel %vm105_vm7, %v108_v2, %v110_v3 }
 0x111   :  { %v119_v5 = vsel %vm105_vm7, %v116_v59, %v118_v0  ;;  %v264_v8 = vmul.u32.u64.low %v120_v1, %v115_v4  ;;  %v265_v9 = vmul.u32.u64.high %v120_v1, %v115_v4, %v264_v8  ;;  %v127_v12 = vmul.u32 %v120_v1, %v111_v10 }
 0x112   :  { %v261_v6 = vmul.u32.u64.low %v120_v1, %v119_v5  ;;  %v262_v7 = vmul.u32.u64.high %v120_v1, %v119_v5, %v261_v6 }
 0x113   :  { %v130_v11 = vadd.s32 1, %v265_v9 }
 0x114   :  { %vm129_vm8 = vc.u32 %v262_v7, %v264_v8  ;;  %v128_v25 = vadd.s32 %v264_v8, %v262_v7 }
 0x115   :  { %v131_v13 = vsel %vm129_vm8, %v130_v11, %v265_v9 }
 0x116   :  { %v132_v14 = vadd.s32 %v131_v13, %v127_v12 }
 0x118   :  { %v133_v15 = vadd.s32 536870912, %v132_v14 }
 0x11a   :  { %v134_v16 = vshrl.u32 %v133_v15, 30 }
 0x11c   :  { %v135_v17 = vshll.u32 %v134_v16, 30  ;;  %v158_v39 = vsub.s32 4, %v134_v16 }
 0x11e   :  { %v136_v18 = vsub.s32 %v132_v14, %v135_v17  ;;  %v159_v42 = vsel %vm74_vm10, %v158_v39, %v134_v16 }
 0x11f   :  { %v161_v43 = vsel %vm73_vm11, 0, %v159_v42 }
 0x120   :  { %v138_v19 = vsub.s32 0, %v136_v18  ;;  %v165_v44 = vadd.s32 3, %v161_v43 }
 0x122   :  { %v184_v20 = vmin.u32 %v138_v19, %v136_v18  ;;  %v166_v45 = vand.u32 3, %v165_v44 }
 0x124   :  { %v140_v21 = vclz %v184_v20  ;;  %vm171_vm12 = vcmp.eq.s32.totalorder %v166_v45, 2  ;;  %vm168_vm13 = vcmp.eq.s32.totalorder %v166_v45, 0  ;;  %vm167_vm14 = vcmp.lt.s32.totalorder %v166_v45, 2 }
 0x126   :  { %v185_v22 = vadd.s32 4294967294, %v140_v21 }
 0x128   :  { %vm186_vm9 = vcmp.lt.s32.totalorder %v185_v22, 0 }
 0x129   :  { %v143_v23 = vsel %vm186_vm9, 0, %v185_v22 }
 0x12a   :  { %v144_v26 = vsub.s32 32, %v143_v23  ;;  %v148_v27 = vsub.s32 4294967266, %v143_v23  ;;  %v145_v28 = vshll.u32 %v136_v18, %v143_v23 }
 0x12c   :  { %v146_v30 = vshrl.u32 %v128_v25, %v144_v26  ;;  %v149_v31 = vadd.s32 127, %v148_v27 }
 0x12e   :  { %v147_v32 = vor.u32 %v146_v30, %v145_v28  ;;  %v150_v33 = vshll.u32 %v149_v31, 23 }
 0x130   :  { %v151_v34 = vor.u32 4788187, %v150_v33  ;;  %v154_v36 = vcvt.s32.f32 %v147_v32 }
 0x132   :  { %v152_v35 = vand.u32 2147483647, %v151_v34 }
 0x134   :  { %v155_v37 = vmul.f32 %v154_v36, %v152_v35 }
 0x136   :  { %v156_v38 = vxor.u32 2147483648, %v155_v37 }
 0x138   :  { %v157_v40 = vsel %vm74_vm10, %v156_v38, %v155_v37 }
 0x139   :  { %v160_v41 = vsel %vm73_vm11, %v255_v24, %v157_v40 }
 0x13a   :  { %209 = vcosq.f32 %v160_v41 }
 0x13b   :  { %211 = vsinq.f32 %v160_v41 }
 0x147   :  { %v210_v46 = vpop.eup %209 }
 0x148   :  { %v212_v47 = vpop.eup %211  ;;  %v172_v48 = vxor.u32 2147483648, %v210_v46 }
 0x149   :  { %v169_v49 = vxor.u32 2147483648, %v212_v47 }
 0x14a   :  { %v173_v50 = vsel %vm171_vm12, %v172_v48, %v212_v47 }
 0x14b   :  { %v170_v51 = vsel %vm168_vm13, %v210_v46, %v169_v49 }
 0x14c   :  { %v174_v29 = vsel %vm167_vm14, %v170_v51, %v173_v50 }
 0x14d   :  { %v175_v52 = vsel %vm164_vm15, nan, %v174_v29 }
 0x14e   :  { %176 = vst [vmem:[%s282_s3] sm:$0xf] %v175_v52 }

</bundles_post_ra>
